<compile_context>
chip_gen: v6e
topology: v6e:2x2x1
jax: 0.10.0
libtpu: 0.0.40
codegen_flags: <defaults>
</compile_context>

<pallas_src>
import jax
import jax.numpy as jnp
from jax.experimental import pallas as pl
from jax.experimental.pallas import tpu as pltpu


LANE = 128       # lane width: pad the output/class dim to a multiple of this
SUBLANE = 16     # sublane granularity used for the batch tile (bf16-safe)


def _round_up(n, m):
    return ((n + m - 1) // m) * m


def _pad_axis(arr, axis, target):
    pad = target - arr.shape[axis]
    if pad == 0:
        return arr
    widths = [(0, 0)] * arr.ndim
    widths[axis] = (0, pad)
    return jnp.pad(arr, widths)


def _choose_tb(B):
    """Adaptive batch tile.

    Small B: track the batch (round up to the 16-row sublane pack) so we don't
    stream/compute zero rows. Large B: grow the tile to amortize per-step
    overhead, but keep >= 2 grid steps so both v7x TensorCores get work.
    """
    bp_min = _round_up(B, SUBLANE)
    if bp_min <= 128:
        return bp_min
    for tb in (1024, 512, 256, 128):
        if _round_up(B, tb) // tb >= 2:
            return tb
    return 128


def mlp_kernel(x_ref, w1_ref, b1_ref, w2_ref, b2_ref, w3_ref, b3_ref, o_ref):
    # Biases read once; (1, N) rows broadcast over the batch tile.
    b1 = b1_ref[...]
    b2 = b2_ref[...]
    b3 = b3_ref[...]

    # In-kernel f32 -> bf16 cast of the streamed activation (no wrapper copy).
    x = x_ref[...].astype(jnp.bfloat16)

    # Layer 1: Linear (bf16 MXU, f32 accumulate) + bias + ReLU in f32.
    h = jnp.dot(x, w1_ref[...], preferred_element_type=jnp.float32)
    h = jnp.maximum(h + b1, 0.0)
    # (Dropout: identity in eval mode)

    # Layer 2.
    h = jnp.dot(h.astype(jnp.bfloat16), w2_ref[...],
                preferred_element_type=jnp.float32)
    h = jnp.maximum(h + b2, 0.0)
    # (Dropout: identity in eval mode)

    # Output layer (no activation). N padded to 128 -> lane-dense, unmasked store.
    out = jnp.dot(h.astype(jnp.bfloat16), w3_ref[...],
                  preferred_element_type=jnp.float32) + b3
    o_ref[...] = out.astype(o_ref.dtype)   # bf16 writeback


def classifier_mlp(x, params):
    """Fused 3-layer MLP: batch-tiled grid, resident bf16 weights, f32 accumulate."""
    w1, b1, w2, b2, w3, b3 = params
    B, in_ch = x.shape
    H1 = w1.shape[1]
    H2 = w2.shape[1]
    num_classes = w3.shape[1]

    TB = _choose_tb(B)
    Bp = _round_up(B, TB)
    N3 = _round_up(num_classes, LANE)    # 10 -> 128 (lane-dense output columns)

    bf16 = jnp.bfloat16
    # x stays f32, unpadded in K; only batch rows are padded to the tile.
    x_p = _pad_axis(x, 0, Bp).astype(jnp.float32)
    w1_p = w1.astype(bf16)                            # (in_ch, 256), no K padding
    w2_p = w2.astype(bf16)                            # (256, 128) already aligned
    w3_p = _pad_axis(w3, 1, N3).astype(bf16)          # zero-pad output columns: exact
    b1_p = b1.astype(jnp.float32)
    b2_p = b2.astype(jnp.float32)
    b3_p = _pad_axis(b3, 1, N3).astype(jnp.float32)

    grid = (Bp // TB,)

    flops = 2 * Bp * (in_ch * H1 + H1 * H2 + H2 * N3)
    bytes_accessed = (
        x_p.size * 4
        + w1_p.size * 2 + w2_p.size * 2 + w3_p.size * 2
        + b1_p.size * 4 + b2_p.size * 4 + b3_p.size * 4
        + Bp * N3 * 2                                  # bf16 output writeback
    )

    # Resident blocks: constant index_map -> DMA'd once, reused every grid step.
    resident = lambda shape: pl.BlockSpec(shape, lambda i: (0, 0))

    out_p = pl.pallas_call(
        mlp_kernel,
        out_shape=jax.ShapeDtypeStruct((Bp, N3), jnp.bfloat16),
        grid_spec=pltpu.PrefetchScalarGridSpec(
            num_scalar_prefetch=0,
            grid=grid,
            in_specs=[
                pl.BlockSpec((TB, in_ch), lambda i: (i, 0)),  # x: streams per batch tile
                resident((in_ch, H1)),                        # w1
                resident((1, H1)),                            # b1
                resident((H1, H2)),                           # w2
                resident((1, H2)),                            # b2
                resident((H2, N3)),                           # w3
                resident((1, N3)),                            # b3
            ],
            out_specs=pl.BlockSpec((TB, N3), lambda i: (i, 0)),
        ),
        compiler_params=pltpu.CompilerParams(
            dimension_semantics=("parallel",),
        ),
        cost_estimate=pl.CostEstimate(
            flops=flops, transcendentals=0, bytes_accessed=bytes_accessed),
    )(x_p, w1_p, b1_p, w2_p, b2_p, w3_p, b3_p)

    # Strip batch / class padding; return f32 logits like the PyTorch module.
    return out_p[:B, :num_classes].astype(jnp.float32)


def init_params(key, in_ch, layers_description, num_classes):
    """Deterministic PyTorch-style (kaiming-uniform-ish) init.

    Weights are produced directly in (in_features, out_features) layout.
    """
    dims = [in_ch] + list(layers_description) + [num_classes]
    params = []
    for i in range(len(dims) - 1):
        fan_in, fan_out = dims[i], dims[i + 1]
        key, kw, kb = jax.random.split(key, 3)
        bound = 1.0 / jnp.sqrt(fan_in)
        w = jax.random.uniform(kw, (fan_in, fan_out), jnp.float32, -bound, bound)
        b = jax.random.uniform(kb, (1, fan_out), jnp.float32, -bound, bound)
        params += [w, b]
    return params


def reference_forward_bf16(x, params):
    """Reference with the same bf16-input / f32-accumulate numerics as the kernel."""
    w1, b1, w2, b2, w3, b3 = params
    bf = jnp.bfloat16
    h = jnp.dot(x.astype(bf), w1.astype(bf), preferred_element_type=jnp.float32)
    h = jnp.maximum(h + b1, 0.0)
    h = jnp.dot(h.astype(bf), w2.astype(bf), preferred_element_type=jnp.float32)
    h = jnp.maximum(h + b2, 0.0)
    return jnp.dot(h.astype(bf), w3.astype(bf), preferred_element_type=jnp.float32) + b3


if __name__ == "__main__":
    key = jax.random.PRNGKey(0)
    k_x, k_p = jax.random.split(key)

    B, in_ch = 8, 32
    layers_description = (256, 128)
    num_classes = 10

    x = jax.random.normal(k_x, (B, in_ch), jnp.float32)
    params = init_params(k_p, in_ch, layers_description, num_classes)

    out = classifier_mlp(x, params)
    out = jax.block_until_ready(out)

    ref = reference_forward_bf16(x, params)
    assert out.shape == (B, num_classes)
    # Tolerance covers the final bf16 writeback quantization on top of the
    # bf16-input / f32-accumulate reference numerics.
    assert jnp.allclose(out, ref, atol=2e-2, rtol=2e-2), "mismatch vs reference"

    print("KERNEL_OK")
</pallas_src>

<mosaic_0001>
module attributes {stable_mosaic.version = 11 : i64} {
  func.func @mlp_kernel(%arg0: i32, %arg1: memref<16x32xf32, #tpu.memory_space<vmem>>, %arg2: memref<32x256xbf16, #tpu.memory_space<vmem>>, %arg3: memref<1x256xf32, #tpu.memory_space<vmem>>, %arg4: memref<256x128xbf16, #tpu.memory_space<vmem>>, %arg5: memref<1x128xf32, #tpu.memory_space<vmem>>, %arg6: memref<128x128xbf16, #tpu.memory_space<vmem>>, %arg7: memref<1x128xf32, #tpu.memory_space<vmem>>, %arg8: memref<16x128xbf16, #tpu.memory_space<vmem>>) attributes {dimension_semantics = [#tpu.dimension_semantics<parallel>], iteration_bounds = array<i64: 1>, scalar_prefetch = 0 : i64, scratch_operands = 0 : i64, tpu.core_type = #tpu.core_type<tc>, window_params = [{transform_indices = @transform_0, window_bounds = array<i64: 16, 32>}, {pipeline_mode = #tpu.pipeline_mode<synchronous>, transform_indices = @transform_1, window_bounds = array<i64: 32, 256>}, {pipeline_mode = #tpu.pipeline_mode<synchronous>, transform_indices = @transform_2, window_bounds = array<i64: 1, 256>}, {pipeline_mode = #tpu.pipeline_mode<synchronous>, transform_indices = @transform_3, window_bounds = array<i64: 256, 128>}, {pipeline_mode = #tpu.pipeline_mode<synchronous>, transform_indices = @transform_4, window_bounds = array<i64: 1, 128>}, {pipeline_mode = #tpu.pipeline_mode<synchronous>, transform_indices = @transform_5, window_bounds = array<i64: 128, 128>}, {pipeline_mode = #tpu.pipeline_mode<synchronous>, transform_indices = @transform_6, window_bounds = array<i64: 1, 128>}, {transform_indices = @transform_7, window_bounds = array<i64: 16, 128>}]} {
    %c0 = arith.constant 0 : index
    %c0_0 = arith.constant 0 : index
    %0 = vector.load %arg3[%c0, %c0_0] : memref<1x256xf32, #tpu.memory_space<vmem>>, vector<1x256xf32>
    %c0_1 = arith.constant 0 : index
    %c0_2 = arith.constant 0 : index
    %1 = vector.load %arg5[%c0_1, %c0_2] : memref<1x128xf32, #tpu.memory_space<vmem>>, vector<1x128xf32>
    %c0_3 = arith.constant 0 : index
    %c0_4 = arith.constant 0 : index
    %2 = vector.load %arg7[%c0_3, %c0_4] : memref<1x128xf32, #tpu.memory_space<vmem>>, vector<1x128xf32>
    %c0_5 = arith.constant 0 : index
    %c0_6 = arith.constant 0 : index
    %3 = vector.load %arg1[%c0_5, %c0_6] : memref<16x32xf32, #tpu.memory_space<vmem>>, vector<16x32xf32>
    %4 = arith.truncf %3 : vector<16x32xf32> to vector<16x32xbf16>
    %c0_7 = arith.constant 0 : index
    %c0_8 = arith.constant 0 : index
    %5 = vector.load %arg2[%c0_7, %c0_8] : memref<32x256xbf16, #tpu.memory_space<vmem>>, vector<32x256xbf16>
    %cst = arith.constant dense<0.000000e+00> : vector<16x256xf32>
    %6 = tpu.matmul %4, %5, %cst {dimension_numbers = #tpu.dot_dimension_numbers<[1], [0], [0], [1], [0, 0, 1, 1], [], []>} : vector<16x32xbf16>, vector<32x256xbf16>, vector<16x256xf32> -> vector<16x256xf32>
    %7 = vector.broadcast %0 : vector<1x256xf32> to vector<16x256xf32>
    %8 = arith.addf %6, %7 : vector<16x256xf32>
    %cst_9 = arith.constant 0.000000e+00 : f32
    %9 = vector.broadcast %cst_9 : f32 to vector<16x256xf32>
    %10 = arith.maximumf %8, %9 : vector<16x256xf32>
    %11 = arith.truncf %10 : vector<16x256xf32> to vector<16x256xbf16>
    %c0_10 = arith.constant 0 : index
    %c0_11 = arith.constant 0 : index
    %12 = vector.load %arg4[%c0_10, %c0_11] : memref<256x128xbf16, #tpu.memory_space<vmem>>, vector<256x128xbf16>
    %cst_12 = arith.constant dense<0.000000e+00> : vector<16x128xf32>
    %13 = tpu.matmul %11, %12, %cst_12 {dimension_numbers = #tpu.dot_dimension_numbers<[1], [0], [0], [1], [0, 0, 1, 1], [], []>} : vector<16x256xbf16>, vector<256x128xbf16>, vector<16x128xf32> -> vector<16x128xf32>
    %14 = vector.broadcast %1 : vector<1x128xf32> to vector<16x128xf32>
    %15 = arith.addf %13, %14 : vector<16x128xf32>
    %cst_13 = arith.constant 0.000000e+00 : f32
    %16 = vector.broadcast %cst_13 : f32 to vector<16x128xf32>
    %17 = arith.maximumf %15, %16 : vector<16x128xf32>
    %18 = arith.truncf %17 : vector<16x128xf32> to vector<16x128xbf16>
    %c0_14 = arith.constant 0 : index
    %c0_15 = arith.constant 0 : index
    %19 = vector.load %arg6[%c0_14, %c0_15] : memref<128x128xbf16, #tpu.memory_space<vmem>>, vector<128x128xbf16>
    %cst_16 = arith.constant dense<0.000000e+00> : vector<16x128xf32>
    %20 = tpu.matmul %18, %19, %cst_16 {dimension_numbers = #tpu.dot_dimension_numbers<[1], [0], [0], [1], [0, 0, 1, 1], [], []>} : vector<16x128xbf16>, vector<128x128xbf16>, vector<16x128xf32> -> vector<16x128xf32>
    %21 = vector.broadcast %2 : vector<1x128xf32> to vector<16x128xf32>
    %22 = arith.addf %20, %21 : vector<16x128xf32>
    %23 = arith.truncf %22 : vector<16x128xf32> to vector<16x128xbf16>
    %c0_17 = arith.constant 0 : index
    %c0_18 = arith.constant 0 : index
    %24 = vector.load %arg8[%c0_17, %c0_18] : memref<16x128xbf16, #tpu.memory_space<vmem>>, vector<16x128xbf16>
    tpu.vector_store %arg8[%c0_17, %c0_18], %23 {strides = array<i32>} : memref<16x128xbf16, #tpu.memory_space<vmem>>, vector<16x128xbf16>,
    return
  }
  func.func @transform_0(%arg0: i32) -> (i32, i32) {
    %c0_i32 = arith.constant 0 : i32
    %c0_i32_0 = arith.constant 0 : i32
    return %arg0, %c0_i32 : i32, i32
  }
  func.func @transform_1(%arg0: i32) -> (i32, i32) {
    %c0_i32 = arith.constant 0 : i32
    %c0_i32_0 = arith.constant 0 : i32
    %c0_i32_1 = arith.constant 0 : i32
    return %c0_i32, %c0_i32_0 : i32, i32
  }
  func.func @transform_2(%arg0: i32) -> (i32, i32) {
    %c0_i32 = arith.constant 0 : i32
    %c0_i32_0 = arith.constant 0 : i32
    %c0_i32_1 = arith.constant 0 : i32
    return %c0_i32, %c0_i32_0 : i32, i32
  }
  func.func @transform_3(%arg0: i32) -> (i32, i32) {
    %c0_i32 = arith.constant 0 : i32
    %c0_i32_0 = arith.constant 0 : i32
    %c0_i32_1 = arith.constant 0 : i32
    return %c0_i32, %c0_i32_0 : i32, i32
  }
  func.func @transform_4(%arg0: i32) -> (i32, i32) {
    %c0_i32 = arith.constant 0 : i32
    %c0_i32_0 = arith.constant 0 : i32
    %c0_i32_1 = arith.constant 0 : i32
    return %c0_i32, %c0_i32_0 : i32, i32
  }
  func.func @transform_5(%arg0: i32) -> (i32, i32) {
    %c0_i32 = arith.constant 0 : i32
    %c0_i32_0 = arith.constant 0 : i32
    %c0_i32_1 = arith.constant 0 : i32
    return %c0_i32, %c0_i32_0 : i32, i32
  }
  func.func @transform_6(%arg0: i32) -> (i32, i32) {
    %c0_i32 = arith.constant 0 : i32
    %c0_i32_0 = arith.constant 0 : i32
    %c0_i32_1 = arith.constant 0 : i32
    return %c0_i32, %c0_i32_0 : i32, i32
  }
  func.func @transform_7(%arg0: i32) -> (i32, i32) {
    %c0_i32 = arith.constant 0 : i32
    %c0_i32_0 = arith.constant 0 : i32
    return %arg0, %c0_i32 : i32, i32
  }
}

</mosaic_0001>

<bundles_post_ra>
// kernel: tpu_custom_call.1
= control target key start
LH: loop header
LB: loop body
LE: loop exit
PB: predicated region body
PF: predicated region fallthrough
CT: control target
= control target key end

     0   :  { %12 = vsyncpa [#allocation3], 0  ;;  %s821_s0 = inlined_call_operand.hbm [shape: f32[16,32], index: 0, kind: input, shape index: {}]   ;;  %s822_s1 = inlined_call_operand.hbm [shape: bf16[32,256], index: 1, kind: input, shape index: {}]   ;;  %s823_s2 = inlined_call_operand.vmem [shape: f32[1,256], index: 2, kind: input, shape index: {}]   ;;  %s824_s3 = inlined_call_operand.hbm [shape: bf16[256,128], index: 3, kind: input, shape index: {}]   ;;  %s825_s4 = inlined_call_operand.vmem [shape: f32[1,128], index: 4, kind: input, shape index: {}]   ;;  %s826_s5 = inlined_call_operand.hbm [shape: bf16[128,128], index: 5, kind: input, shape index: {}]   ;;  %s827_s6 = inlined_call_operand.vmem [shape: f32[1,128], index: 6, kind: input, shape index: {}]   ;;  %s828_s7 = inlined_call_operand.hbm [shape: bf16[16,128], index: 7, kind: output, shape index: {}]  }
   0x1   :  { %13 = vsyncpa [#allocation6], 0 }
   0x2   :  { %14 = vsyncpa [#allocation9], 0 }
   0x3   :  { %15 = vsyncpa [#allocation4], 0  ;;  %s736_s24 = smov [#allocation5]   ;;  %s737_s26 = smov [#allocation2]  }
   0x4   :  { %s33_s25 = sshll.u32 %s736_s24, 4  ;;  %s21_s27 = sshll.u32 %s737_s26, 4  ;;  %s34_s25 = int_to_ptr.vmem [resolvable:$true] %s33_s25  ;;  %s22_s27 = int_to_ptr.vmem [resolvable:$true] %s21_s27 }
   0x5   :  { %s636_s28 = scalar_lea.vmem %s34_s25, 512  ;;  %p641_p1 = scmp.lt.s32.totalorder %s34_s25, %s34_s25 }
   0x6   :  { %p637_p0 = scmp.ne.s32.totalorder %s34_s25, %s636_s28  ;;  %p642_p2 = scmp.lt.s32.totalorder %s636_s28, %s636_s28 }
   0x8   :  { %p643_p3 = por %p642_p2, %p641_p1 }
   0xa   :  { %p644_p4 = pnand %p643_p3, %p637_p0 }
   0xc   :  { %647 = shalt.err (!%p644_p4)
}
   0xd   :  { %s738_s29 = smov 128   ;;  %s739_s30 = smov 8  }
   0xe   :  { %39 = dma.hbm_to_vmem [thread:$0]  %s822_s1, 512, %s34_s25, [#allocation6], %s738_s29, %s738_s29, %s739_s30  }
   0xf   :  { %s656_s10 = scalar_lea.vmem %s22_s27, 256  ;;  %p661_p6 = scmp.lt.s32.totalorder %s22_s27, %s22_s27 }
  0x10   :  { %p657_p5 = scmp.ne.s32.totalorder %s22_s27, %s656_s10  ;;  %p662_p7 = scmp.lt.s32.totalorder %s656_s10, %s656_s10 }
  0x12   :  { %p663_p8 = por %p662_p7, %p661_p6 }
  0x14   :  { %p664_p9 = pnand %p663_p8, %p657_p5 }
  0x16   :  { %667 = shalt.err (!%p664_p9)
}
  0x17   :  { %27 = dma.hbm_to_vmem [thread:$0]  %s821_s0, 256, %s22_s27, [#allocation3], %s738_s29, %s738_s29, %s739_s30  }
  0x18   :  { %s740_s13 = smov [#allocation7]  }
  0x19   :  { %s47_s14 = sshll.u32 %s740_s13, 4  ;;  %s48_s14 = int_to_ptr.vmem [resolvable:$true] %s47_s14 }
  0x1a   :  { %s676_s15 = scalar_lea.vmem %s48_s14, 2048  ;;  %p681_p11 = scmp.lt.s32.totalorder %s48_s14, %s48_s14 }
  0x1b   :  { %p677_p10 = scmp.ne.s32.totalorder %s48_s14, %s676_s15  ;;  %p682_p12 = scmp.lt.s32.totalorder %s676_s15, %s676_s15 }
  0x1d   :  { %p683_p13 = por %p682_p12, %p681_p11 }
  0x1f   :  { %p684_p0 = pnand %p683_p13, %p677_p10 }
  0x21   :  { %687 = shalt.err (!%p684_p0)
}
  0x22   :  { %s741_s1 = smov 64   ;;  %s742_s16 = smov 4  }
  0x23   :  { %53 = dma.hbm_to_vmem [thread:$0]  %s824_s3, 2048, %s48_s14, [#allocation6], %s741_s1, %s741_s1, %s742_s16  }
  0x24   :  { %s743_s0 = smov [#allocation8]  }
  0x25   :  { %s61_s19 = sshll.u32 %s743_s0, 4  ;;  %s62_s19 = int_to_ptr.vmem [resolvable:$true] %s61_s19 }
  0x26   :  { %s696_s20 = scalar_lea.vmem %s62_s19, 1024  ;;  %p701_p2 = scmp.lt.s32.totalorder %s62_s19, %s62_s19 }
  0x27   :  { %p697_p1 = scmp.ne.s32.totalorder %s62_s19, %s696_s20  ;;  %p702_p3 = scmp.lt.s32.totalorder %s696_s20, %s696_s20 }
  0x29   :  { %p703_p4 = por %p702_p3, %p701_p2 }
  0x2b   :  { %p704_p5 = pnand %p703_p4, %p697_p1 }
  0x2d   :  { %707 = shalt.err (!%p704_p5)
}
  0x2e   :  { %67 = dma.hbm_to_vmem [thread:$0]  %s826_s5, 1024, %s62_s19, [#allocation9], %s741_s1, %s741_s1, %s742_s16  }
  0x2f   :  { %728 = dma.done.wait [#allocation3], 256  }
  0x30   :  { %729 = vsyncadd [#allocation3], 4294967040 }
  0x31   :  { %730 = dma.done.wait [#allocation6], 2560  }
  0x32   :  { %731 = vsyncadd [#allocation6], 4294964736 }
  0x33   :  { %732 = dma.done.wait [#allocation9], 1024  }
  0x34   :  { %733 = vsyncadd [#allocation9], 4294966272  ;;  %v744_v0 = vmov 0   ;;  %v598_v1 = vld [vmem:[#allocation5 + $0x14] ss:$8 sps:$4 sm:$0xff]   ;;  %vm124_vm0 = vcmask 261120   ;;  %v94_v29 = vlaneseq }
  0x35   :  { %160 = vmatprep.mubr.bf16.mxu0 %v744_v0  ;;  %v600_v2 = vld [vmem:[#allocation5 + $0x10] ss:$8 sps:$4 sm:$0xff]   ;;  %140 = vmatprep.subr.bf16.mxu0 %v598_v1  ;;  %v601_v3 = vld [vmem:[#allocation5 + $0x4] ss:$8 sps:$4 sm:$0xff]   ;;  %v603_v4 = vld [vmem:[#allocation5] ss:$8 sps:$4 sm:$0xff]  }
  0x36   :  { %v86_v5 = vld [vmem:[#allocation2] sm:$0xff]  ;;  %141 = vmatpush1.bf16.msra.mxu0 %v600_v2  ;;  %v87_v6 = vld [vmem:[#allocation2 + $0x8] sm:$0xff]  ;;  %v608_v12 = vld [vmem:[#allocation7 + $0x68] sm:$0xff]   ;;  %v745_v25 = vmov 0.0   ;;  %v95_v30 = vshrl.u32 %v94_v29, 7  ;;  %vm746_vm1 = vmmov 0  }
  0x37   :  { %142 = vmatprep.subr.bf16.mxu0 %v601_v3  ;;  %v604_v7 = vld [vmem:[#allocation7 + $0x78] sm:$0xff]   ;;  %v88_v9 = vpack.c.bf16 %v87_v6, %v86_v5  ;;  %v606_v10 = vld [vmem:[#allocation7 + $0x70] sm:$0xff]   ;;  %v609_v13 = vld [vmem:[#allocation7 + $0x28] sm:$0xff]   ;;  %s747_s26 = smov [#allocation10]  }
  0x38   :  { %v605_v8 = vld [vmem:[#allocation7 + $0x38] sm:$0xff]   ;;  %535 = vmatprep.subr.bf16.mxu1 %v604_v7  ;;  %v607_v11 = vld [vmem:[#allocation7 + $0x30] sm:$0xff]   ;;  %v610_v14 = vld [vmem:[#allocation7 + $0x60] sm:$0xff]   ;;  %v100_v31 = vsub.s32 1, %v95_v30  ;;  %v96_v32 = vsub.s32 0, %v95_v30  ;;  %s481_s27 = sshll.u32 %s747_s26, 4  ;;  %s482_s27 = int_to_ptr.vmem [resolvable:$true] %s481_s27 }
  0x39   :  { %536 = vmatpush3.bf16.msra.mxu1 %v605_v8  ;;  %v611_v15 = vld [vmem:[#allocation7 + $0x20] sm:$0xff]   ;;  %v612_v16 = vld [vmem:[#allocation7 + $0x58] sm:$0xff]   ;;  %v614_v18 = vld [vmem:[#allocation7 + $0x50] sm:$0xff]   ;;  %p713_p7 = scmp.lt.s32.totalorder %s482_s27, %s482_s27 }
  0x3a   :  { %143 = vmatpush1.bf16.msra.mxu0 %v603_v4  ;;  %537 = vmatprep.subr.bf16.mxu1 %v606_v10  ;;  %v613_v17 = vld [vmem:[#allocation7 + $0x18] sm:$0xff]   ;;  %v615_v19 = vld [vmem:[#allocation7 + $0x10] sm:$0xff]   ;;  %v616_v20 = vld [vmem:[#allocation7 + $0x48] sm:$0xff]  }
  0x3b   :  { %v617_v21 = vld [vmem:[#allocation7 + $0x8] sm:$0xff]   ;;  %v618_v22 = vld [vmem:[#allocation7 + $0x40] sm:$0xff]   ;;  %v620_v24 = vld [vmem:[#allocation8 + $0x38] sm:$0xff]   ;;  %566 = vmatprep.subr.bf16.mxu0 %v745_v25 }
  0x3c   :  { %v619_v23 = vld [vmem:[#allocation7] sm:$0xff]   ;;  %v621_v26 = vld [vmem:[#allocation8 + $0x30] sm:$0xff]   ;;  %v622_v27 = vld [vmem:[#allocation8 + $0x28] sm:$0xff]  }
  0x3d   :  { %499 = vmatmul.mubr.msk.bf16.vlgmr.msra.gmra.mxu0 %vm124_vm0, %v88_v9  ;;  %538 = vmatpush3.bf16.msra.mxu1 %v607_v11  ;;  %v623_v28 = vld [vmem:[#allocation8 + $0x20] sm:$0xff]   ;;  %v83_v33 = vld [vmem:[%s823_s2] sm:$0x3]  ;;  %v624_v50 = vld [vmem:[#allocation8 + $0x18] sm:$0xff]  }
  0x3e   :  { %539 = vmatprep.subr.bf16.mxu1 %v608_v12  ;;  %567 = vmatpush3.bf16.msra.mxu0 %v620_v24  ;;  %v101_v35 = vrot.slane %v83_v33, %v100_v31  ;;  %v97_v36 = vrot.slane %v83_v33, %v96_v32  ;;  %v625_v51 = vld [vmem:[#allocation8 + $0x10] sm:$0xff]   ;;  %v626_v52 = vld [vmem:[#allocation8 + $0x8] sm:$0xff]   ;;  %v627_v53 = vld [vmem:[#allocation8] sm:$0xff]  }
  0x3f   :  { %568 = vmatprep.subr.bf16.mxu0 %v745_v25  ;;  %582 = vmatprep.mubr.msk.bf16.mxu0 %vm746_vm1, %v745_v25  ;;  %v500_v57 = vld [vmem:[%s825_s4] ss:$0 sm:$0xff]  ;;  %s708_s4 = scalar_lea.vmem %s482_s27, 128 }
  0x40   :  { %v517_v3 = vld [vmem:[%s827_s6] ss:$0 sm:$0xff]  ;;  %p709_p6 = scmp.ne.s32.totalorder %s482_s27, %s708_s4  ;;  %p714_p8 = scmp.lt.s32.totalorder %s708_s4, %s708_s4 }
  0x41   :  { %540 = vmatpush3.bf16.msra.mxu1 %v609_v13 }
  0x42   :  { %541 = vmatprep.subr.bf16.mxu1 %v610_v14  ;;  %569 = vmatpush3.bf16.msra.mxu0 %v621_v26  ;;  %p715_p9 = por %p714_p8, %p713_p7 }
  0x43   :  { %570 = vmatprep.subr.bf16.mxu0 %v745_v25 }
  0x44   :  { %p716_p10 = pnand %p715_p9, %p709_p6 }
  0x45   :  { %542 = vmatpush3.bf16.msra.mxu1 %v611_v15 }
  0x46   :  { %543 = vmatprep.subr.bf16.mxu1 %v612_v16  ;;  %571 = vmatpush3.bf16.msra.mxu0 %v622_v27 }
  0x47   :  { %572 = vmatprep.subr.bf16.mxu0 %v745_v25 }
  0x49   :  { %544 = vmatpush3.bf16.msra.mxu1 %v613_v17 }
  0x4a   :  { %545 = vmatprep.subr.bf16.mxu1 %v614_v18  ;;  %573 = vmatpush3.bf16.msra.mxu0 %v623_v28 }
  0x4b   :  { %574 = vmatprep.subr.bf16.mxu0 %v745_v25 }
  0x4d   :  { %546 = vmatpush3.bf16.msra.mxu1 %v615_v19 }
  0x4e   :  { %547 = vmatprep.subr.bf16.mxu1 %v616_v20  ;;  %575 = vmatpush3.bf16.msra.mxu0 %v624_v50 }
  0x4f   :  { %576 = vmatprep.subr.bf16.mxu0 %v745_v25 }
  0x51   :  { %548 = vmatpush3.bf16.msra.mxu1 %v617_v21 }
  0x52   :  { %549 = vmatprep.subr.bf16.mxu1 %v618_v22  ;;  %577 = vmatpush3.bf16.msra.mxu0 %v625_v51 }
  0x53   :  { %578 = vmatprep.subr.bf16.mxu0 %v745_v25 }
  0x55   :  { %550 = vmatpush3.bf16.msra.mxu1 %v619_v23 }
  0x56   :  { %579 = vmatpush3.bf16.msra.mxu0 %v626_v52 }
  0x57   :  { %580 = vmatprep.subr.bf16.mxu0 %v745_v25 }
  0x5a   :  { %581 = vmatpush3.bf16.msra.mxu0 %v627_v53 }
  0xfd   :  { %v162_v34 = vpop.f32.mrf.mxu0 }
  0xfe   :  { %v163_v41 = vadd.f32 %v162_v34, %v97_v36 }
  0xff   :  { %v164_v37 = vpop.f32.mrf.mxu0 }
 0x100   :  { %v165_v39 = vadd.f32 %v164_v37, %v101_v35  ;;  %v171_v47 = vmax.f32 %v163_v41, 0.0 }
 0x101   :  { %v166_v38 = vpop.f32.mrf.mxu0 }
 0x102   :  { %v167_v40 = vadd.f32 %v166_v38, %v97_v36  ;;  %v172_v45 = vmax.f32 %v165_v39, 0.0 }
 0x103   :  { %v168_v42 = vpop.f32.mrf.mxu0 }
 0x104   :  { %v169_v43 = vadd.f32 %v168_v42, %v101_v35  ;;  %v173_v44 = vmax.f32 %v167_v40, 0.0 }
 0x106   :  { %v174_v46 = vmax.f32 %v169_v43, 0.0  ;;  %v175_v49 = vpack.c.bf16 %v173_v44, %v171_v47 }
 0x108   :  { %v176_v48 = vpack.c.bf16 %v174_v46, %v172_v45 }
 0x10a   :  { %343 = vmatprep.mubr.bf16.mxu1 %v176_v48 }
 0x10b   :  { %344 = vmatmul.mubr.bf16.vlgmr.msra.gmra.mxu1 %v175_v49 }
 0x1cb   :  { %v551_v54 = vpop.f32.mrf.mxu1 }
 0x1cd   :  { %v552_v55 = vpop.f32.mrf.mxu1 }
 0x1ce   :  { %v553_v56 = vadd.f32 %v552_v55, %v551_v54 }
 0x1cf   :  { %v554_v58 = vpop.f32.mrf.mxu1 }
 0x1d0   :  { %v346_v60 = vadd.f32 %v553_v56, %v500_v57 }
 0x1d1   :  { %v555_v59 = vpop.f32.mrf.mxu1 }
 0x1d2   :  { %v556_v61 = vadd.f32 %v555_v59, %v554_v58  ;;  %v352_v63 = vmax.f32 %v346_v60, 0.0 }
 0x1d4   :  { %v349_v62 = vadd.f32 %v556_v61, %v500_v57 }
 0x1d6   :  { %v353_v0 = vmax.f32 %v349_v62, 0.0 }
 0x1d8   :  { %v354_v1 = vpack.c.bf16 %v353_v0, %v352_v63 }
 0x1da   :  { %583 = vmatmul.mubr.bf16.vlgmr.msra.gmra.mxu0 %v354_v1 }
 0x29a   :  { %v459_v2 = vpop.f32.mrf.mxu0 }
 0x29b   :  { %v460_v6 = vadd.f32 %v517_v3, %v459_v2 }
 0x29c   :  { %v584_v4 = vpop.f32.mrf.mxu0 }
 0x29e   :  { %v462_v5 = vpop.f32.mrf.mxu0 }
 0x29f   :  { %v463_v7 = vadd.f32 %v517_v3, %v462_v5 }
 0x2a0   :  { %v585_v8 = vpop.f32.mrf.mxu0 }
 0x2a1   :  { %v533_v9 = vpack.c.bf16 %v463_v7, %v460_v6 }
 0x2a3   :  { %534 = vst [vmem:[#allocation10] sm:$0xff] %v533_v9  }
 0x2a4   :  { %719 = shalt.err (!%p716_p10)
}
 0x2a5   :  { %487 = dma.vmem_to_hbm [thread:$0]  %s482_s27, 128, %s828_s7, [#allocation4], %s741_s1, %s741_s1, %s742_s16  }
 0x2a6   :  { %734 = dma.done.wait [#allocation4], 128  }
 0x2a7   :  { %735 = vsyncadd [#allocation4], 4294967168 }
 0x2a8   :  { %491 = vsyncpa [#allocation3], 1 }
 0x2a9   :  { %492 = vsyncpa [#allocation6], 1 }
 0x2aa   :  { %493 = vsyncpa [#allocation9], 1 }
 0x2ab   :  { %494 = vsyncpa [#allocation4], 1 }

</bundles_post_ra>
